<compile_context>
chip_gen: v5e
topology: v5e:2x2
jax: 0.10.0
libtpu: 0.0.40
codegen_flags: <defaults>
</compile_context>

<pallas_src>
import jax
import jax.numpy as jnp
from jax.experimental import pallas as pl
from jax.experimental.pallas import tpu as pltpu


_COLS = 512                        # lane-dense tile width (multiple of 128 -> unmasked vst)
_SUBLANE = 32                      # row multiple safe for f32/bf16/int8 sublane packing
_TARGET_TILE_BYTES = 4 * 1024 * 1024   # ~4 MiB per tile (good for v7x 3.2 TB/s; fine on v5e/v6e)
_MIN_STEPS = 4                     # force >=4 grid steps for non-tiny inputs (pipeline + dual-TC)
_VMEM_LIMIT_BYTES = 32 * 1024 * 1024   # explicit scoped-VMEM limit; covers v5e's 16 MiB default


def _hs_math(x):
    # Weak-typed python constants keep bf16 math in bf16; matches torch formula.
    return x * (jnp.clip(x + 3.0, 0.0, 6.0) / 6.0)


def _hs_kernel(x_ref, o_ref):
    o_ref[...] = _hs_math(x_ref[...]).astype(o_ref.dtype)


def _round_up(a, b):
    return (a + b - 1) // b * b


def _choose_tile_rows(rows, itemsize):
    """Byte-budgeted, dtype-aware row count per tile; guarantees multi-step grids
    for medium/large inputs while keeping tiny inputs on a single block."""
    budget = max(_SUBLANE,
                 (_TARGET_TILE_BYTES // (_COLS * itemsize)) // _SUBLANE * _SUBLANE)
    if rows > _SUBLANE * _MIN_STEPS:
        tm = min(budget, _round_up(pl.cdiv(rows, _MIN_STEPS), _SUBLANE))
    else:
        tm = rows
    if tm >= rows:
        tm = rows  # single block; block row-dim == full array dim is always legal
    return tm


def _hs_bulk(x2d):
    rows = x2d.shape[0]
    tm = _choose_tile_rows(rows, jnp.dtype(x2d.dtype).itemsize)
    grid = pl.cdiv(rows, tm)  # partial trailing block handled by Pallas masking
    return pl.pallas_call(
        _hs_kernel,
        out_shape=jax.ShapeDtypeStruct(x2d.shape, x2d.dtype),
        grid_spec=pl.GridSpec(
            grid=(grid,),
            in_specs=[pl.BlockSpec((tm, _COLS), lambda i: (i, 0))],
            out_specs=pl.BlockSpec((tm, _COLS), lambda i: (i, 0)),
        ),
        compiler_params=pltpu.CompilerParams(
            dimension_semantics=("parallel",),
            vmem_limit_bytes=_VMEM_LIMIT_BYTES,
        ),
    )(x2d)


def hard_swish(x):
    """Elementwise hard-swish via a tiled, pipelined Pallas TPU kernel."""
    orig_shape = x.shape
    total = x.size
    rows = total // _COLS
    tail = total - rows * _COLS

    if rows == 0:
        # Tiny tensor (< 512 elements): kernel launch overhead would dominate.
        return _hs_math(x)

    flat = x.reshape(-1)

    if tail == 0:
        # Common case: zero-copy reshape in, zero-copy reshape out. Pure 2N HBM traffic.
        return _hs_bulk(flat.reshape(rows, _COLS)).reshape(orig_shape)

    # Ragged case: lane-dense bulk through the kernel, <512-element tail in jnp,
    # stitched back together (no full-tensor pad).
    out_bulk = _hs_bulk(flat[: rows * _COLS].reshape(rows, _COLS)).reshape(-1)
    out_tail = _hs_math(flat[rows * _COLS:])
    return jnp.concatenate([out_bulk, out_tail]).reshape(orig_shape)


if __name__ == "__main__":
    key = jax.random.PRNGKey(0)
    x = jax.random.normal(key, (2, 4, 16, 16), dtype=jnp.float32)
    out = hard_swish(x)
    jax.block_until_ready(out)
    ref = x * (jnp.clip(x + 3.0, 0.0, 6.0) / 6.0)
    assert out.shape == x.shape
    assert jnp.allclose(out, ref, atol=1e-6, rtol=1e-6), "mismatch vs reference"

    # Ragged total (not a multiple of 512): bulk kernel + jnp tail stitch path.
    x2 = jax.random.normal(jax.random.PRNGKey(1), (3, 7, 37, 53), dtype=jnp.float32)
    out2 = hard_swish(x2)
    jax.block_until_ready(out2)
    ref2 = x2 * (jnp.clip(x2 + 3.0, 0.0, 6.0) / 6.0)
    assert jnp.allclose(out2, ref2, atol=1e-6, rtol=1e-6), "mismatch (ragged path)"

    # Multi-step grid with a partial trailing row-block plus a ragged tail.
    x3 = jax.random.normal(jax.random.PRNGKey(2), (2, 8, 70, 70), dtype=jnp.float32)
    out3 = hard_swish(x3)
    jax.block_until_ready(out3)
    ref3 = x3 * (jnp.clip(x3 + 3.0, 0.0, 6.0) / 6.0)
    assert jnp.allclose(out3, ref3, atol=1e-6, rtol=1e-6), "mismatch (tiled path)"

    # bf16 path exercises the byte-budget (dtype-aware) tile sizing.
    x4 = jax.random.normal(jax.random.PRNGKey(3), (4, 16, 32, 32), dtype=jnp.bfloat16)
    out4 = hard_swish(x4)
    jax.block_until_ready(out4)
    ref4 = x4 * (jnp.clip(x4 + 3.0, 0.0, 6.0) / 6.0)
    assert jnp.allclose(out4.astype(jnp.float32), ref4.astype(jnp.float32),
                        atol=1e-2, rtol=1e-2), "mismatch (bf16 path)"

    print("KERNEL_OK")
</pallas_src>

<mosaic_0001>
module attributes {stable_mosaic.version = 11 : i64} {
  func.func @_hs_kernel(%arg0: i32, %arg1: memref<4x512xf32, #tpu.memory_space<vmem>>, %arg2: memref<4x512xf32, #tpu.memory_space<vmem>>) attributes {dimension_semantics = [#tpu.dimension_semantics<parallel>], iteration_bounds = array<i64: 1>, scalar_prefetch = 0 : i64, scratch_operands = 0 : i64, tpu.core_type = #tpu.core_type<tc>, window_params = [{transform_indices = @transform_0, window_bounds = array<i64: 4, 512>}, {transform_indices = @transform_1, window_bounds = array<i64: 4, 512>}]} {
    %c0 = arith.constant 0 : index
    %c0_0 = arith.constant 0 : index
    %0 = vector.load %arg1[%c0, %c0_0] : memref<4x512xf32, #tpu.memory_space<vmem>>, vector<4x512xf32>
    %cst = arith.constant 3.000000e+00 : f32
    %1 = vector.broadcast %cst : f32 to vector<4x512xf32>
    %2 = arith.addf %0, %1 : vector<4x512xf32>
    %cst_1 = arith.constant 0.000000e+00 : f32
    %cst_2 = arith.constant 6.000000e+00 : f32
    %3 = vector.broadcast %cst_1 : f32 to vector<4x512xf32>
    %4 = arith.maximumf %3, %2 : vector<4x512xf32>
    %5 = vector.broadcast %cst_2 : f32 to vector<4x512xf32>
    %6 = arith.minimumf %5, %4 : vector<4x512xf32>
    %cst_3 = arith.constant 6.000000e+00 : f32
    %7 = vector.broadcast %cst_3 : f32 to vector<4x512xf32>
    %8 = arith.divf %6, %7 : vector<4x512xf32>
    %9 = arith.mulf %0, %8 : vector<4x512xf32>
    %c0_4 = arith.constant 0 : index
    %c0_5 = arith.constant 0 : index
    %10 = vector.load %arg2[%c0_4, %c0_5] : memref<4x512xf32, #tpu.memory_space<vmem>>, vector<4x512xf32>
    tpu.vector_store %arg2[%c0_4, %c0_5], %9 {strides = array<i32>} : memref<4x512xf32, #tpu.memory_space<vmem>>, vector<4x512xf32>,
    return
  }
  func.func @transform_0(%arg0: i32) -> (i32, i32) {
    %c0_i32 = arith.constant 0 : i32
    %c0_i32_0 = arith.constant 0 : i32
    return %arg0, %c0_i32 : i32, i32
  }
  func.func @transform_1(%arg0: i32) -> (i32, i32) {
    %c0_i32 = arith.constant 0 : i32
    %c0_i32_0 = arith.constant 0 : i32
    return %arg0, %c0_i32 : i32, i32
  }
}

</mosaic_0001>

<bundles_post_ra>
// kernel: tpu_custom_call.1
= control target key start
LH: loop header
LB: loop body
LE: loop exit
PB: predicated region body
PF: predicated region fallthrough
CT: control target
= control target key end

     0   :  { %6 = vsyncpa [#allocation3], 0  ;;  %s137_s0 = inlined_call_operand.hbm [shape: f32[4,512], index: 0, kind: input, shape index: {}]   ;;  %s138_s1 = inlined_call_operand.hbm [shape: f32[4,512], index: 1, kind: output, shape index: {}]  }
   0x1   :  { %7 = vsyncpa [#allocation4], 0  ;;  %s13_s8 = sshll.u32 %s137_s0, 4  ;;  %s118_s9 = smov [#allocation2]   ;;  %s14_s8 = int_to_ptr.hbm [resolvable:$true] %s13_s8 }
   0x2   :  { %s15_s10 = sshll.u32 %s118_s9, 4  ;;  %s16_s10 = int_to_ptr.vmem [resolvable:$true] %s15_s10 }
   0x3   :  { %18 = dma.hbm_to_vmem [thread:$0]  %s14_s8, 256, %s16_s10, [#allocation3]  }
   0x4   :  { %114 = dma.done.wait [#allocation3], 256  }
   0x5   :  { %115 = vsyncadd [#allocation3], 4294967040  ;;  %v119_v0 = vmov 6.0   ;;  %v23_v2 = vld [vmem:[#allocation2] sm:$0xff]  ;;  %v24_v3 = vld [vmem:[#allocation2 + $0x8] sm:$0xff]  ;;  %s120_s0 = smov [#allocation5]  }
   0x6   :  { %64 = vrcp.f32 %v119_v0  ;;  %v25_v4 = vadd.f32 3.0, %v23_v2  ;;  %v26_v6 = vadd.f32 3.0, %v24_v3  ;;  %s49_s11 = sshll.u32 %s120_s0, 4  ;;  %s51_s14 = sshll.u32 %s138_s1, 4  ;;  %s50_s11 = int_to_ptr.vmem [resolvable:$true] %s49_s11  ;;  %s52_s14 = int_to_ptr.hbm [resolvable:$true] %s51_s14 }
   0x8   :  { %v27_v7 = vmax.f32 %v25_v4, 0.0  ;;  %v28_v9 = vmax.f32 %v26_v6, 0.0 }
   0xa   :  { %v29_v11 = vmin.f32 %v27_v7, 6.0  ;;  %v30_v12 = vmin.f32 %v28_v9, 6.0 }
   0xc   :  { %v65_v1 = vpop.eup %64 }
   0xd   :  { %v32_v5 = vmul.f32 6.0, %v65_v1  ;;  %vm36_vm0 = vweird.f32 %v65_v1 }
   0xf   :  { %v33_v8 = vsub.f32 1.0, %v32_v5 }
  0x11   :  { %v34_v10 = vmul.f32 %v65_v1, %v33_v8 }
  0x13   :  { %v35_v13 = vadd.f32 %v65_v1, %v34_v10 }
  0x15   :  { %v37_v14 = vsel %vm36_vm0, %v65_v1, %v35_v13 }
  0x16   :  { %v38_v15 = vmul.f32 %v37_v14, %v29_v11  ;;  %v39_v16 = vmul.f32 %v37_v14, %v30_v12 }
  0x18   :  { %v40_v17 = vmul.f32 %v38_v15, %v23_v2  ;;  %v41_v18 = vmul.f32 %v39_v16, %v24_v3 }
  0x1a   :  { %42 = vst [vmem:[#allocation5] sm:$0xff] %v40_v17 }
  0x1b   :  { %43 = vst [vmem:[#allocation5 + $0x8] sm:$0xff] %v41_v18 }
  0x1c   :  { %54 = dma.vmem_to_hbm [thread:$0]  %s50_s11, 256, %s52_s14, [#allocation4]  }
  0x1d   :  { %116 = dma.done.wait [#allocation4], 256  }
  0x1e   :  { %117 = vsyncadd [#allocation4], 4294967040 }
  0x1f   :  { %59 = vsyncpa [#allocation3], 1 }
  0x20   :  { %60 = vsyncpa [#allocation4], 1 }

</bundles_post_ra>
